<compile_context>
chip_gen: v7x
topology: tpu7x:2x2x1
jax: 0.10.0
libtpu: 0.0.40
codegen_flags: <defaults>
</compile_context>

<pallas_src>
import functools

import jax
import jax.numpy as jnp
from jax.experimental import pallas as pl
from jax.experimental.pallas import tpu as pltpu


def _round_up(v, m):
    return ((v + m - 1) // m) * m


def _choose_row_tile(m_rows):
    """Largest row tile in {512..4096} that keeps >=4 grid steps; tiny M -> one tile."""
    if m_rows <= 512:
        return _round_up(max(m_rows, 8), 16)     # multiple of 16: valid for f32 & bf16
    for cand in (4096, 2048, 1024, 512):
        if m_rows >= 4 * cand:
            return cand
    return 512


def _graphblock_kernel(x_ref, scale_ref, w_ref, b_ref, out_ref):
    """One row tile: scale -> linear -> relu -> fused lane-dense (his | fut) store."""
    x = x_ref[...].astype(jnp.float32)                      # [tm, D]
    s = scale_ref[...]                                      # [tm, 1] f32, row-broadcast
    y = jnp.dot(x * s, w_ref[...].astype(jnp.float32),
                preferred_element_type=jnp.float32)         # [tm, 2C] on the MXU
    y = jnp.maximum(y + b_ref[...], 0.0)                    # bias + relu
    c = y.shape[-1] // 2
    fused = jnp.concatenate([x - y[:, :c], y[:, c:]], axis=-1)   # [tm, 2C] lane-dense
    out_ref[...] = fused.astype(out_ref.dtype)


@functools.partial(jax.jit, static_argnames=("out_c",))
def graphblock_forward(x, graph, w, b, *, out_c):
    """x: [B,n,T,D]; graph: [n,n] or [B,n,n]; w: [D, 2*out_c]; b: [2*out_c]."""
    B, n, T, D = x.shape
    assert D == out_c, "x - out1[..., :out_c] requires D == out_c"

    # --- glue: the einsum reduces to a per-(batch,node) diagonal scale -------
    if graph.ndim == 2:
        if graph.shape[0] != graph.shape[1] or graph.shape[0] != n:
            raise ValueError(f"2-D graph must be square [n,n]={n}, got {graph.shape}")
        diag = jnp.diagonal(graph)                               # [n]
        scale = jnp.broadcast_to(diag[None, :, None], (B, n, T))
    elif graph.ndim == 3:
        if graph.shape != (B, n, n):
            raise ValueError(f"3-D graph must be [B,n,n]={(B, n, n)}, got {graph.shape}")
        diag = jnp.diagonal(graph, axis1=1, axis2=2)             # [B, n]
        scale = jnp.broadcast_to(diag[:, :, None], (B, n, T))
    else:
        raise ValueError(f"graph must be 2-D or 3-D, got ndim={graph.ndim}")

    M = B * n * T
    io_dtype = x.dtype                                # keep caller dtype on HBM path
    x2 = x.reshape(M, D)
    scale2 = scale.reshape(M, 1).astype(jnp.float32)  # tiny vs x / output traffic
    b2 = b.reshape(1, 2 * out_c).astype(jnp.float32)

    # --- row-tile selection + tail padding (cdiv grid) -----------------------
    tm = _choose_row_tile(M)
    num_tiles = pl.cdiv(M, tm)
    Mp = num_tiles * tm
    if Mp != M:
        pad = Mp - M
        x2 = jnp.pad(x2, ((0, pad), (0, 0)))
        scale2 = jnp.pad(scale2, ((0, pad), (0, 0)))

    # --- explicit VMEM budget: double-buffered tiles + residents + headroom --
    itemsize = jnp.dtype(io_dtype).itemsize
    tile_bytes = tm * (D * itemsize + 4 + 2 * out_c * itemsize)
    resident_bytes = D * 2 * out_c * jnp.dtype(w.dtype).itemsize + 2 * out_c * 4
    vmem_limit = int(min(max(6 * tile_bytes + resident_bytes, 16 << 20), 32 << 20))

    fused = pl.pallas_call(
        _graphblock_kernel,
        out_shape=jax.ShapeDtypeStruct((Mp, 2 * out_c), io_dtype),
        grid_spec=pltpu.PrefetchScalarGridSpec(
            num_scalar_prefetch=0,
            grid=(num_tiles,),
            in_specs=[
                pl.BlockSpec((tm, D), lambda i: (i, 0)),          # x rows
                pl.BlockSpec((tm, 1), lambda i: (i, 0)),          # per-row scale
                pl.BlockSpec((D, 2 * out_c), lambda i: (0, 0)),   # W (resident)
                pl.BlockSpec((1, 2 * out_c), lambda i: (0, 0)),   # bias (resident)
            ],
            out_specs=pl.BlockSpec((tm, 2 * out_c), lambda i: (i, 0)),   # (his | fut)
        ),
        compiler_params=pltpu.CompilerParams(
            dimension_semantics=("parallel",),
            vmem_limit_bytes=vmem_limit,
        ),
    )(x2, scale2, w, b2)

    his = fused[:M, :out_c].reshape(B, n, T, out_c)
    fut = fused[:M, out_c:].reshape(B, n, T, out_c)
    return his, fut


def _reference(x, graph, w, b, out_c):
    """Pure-JAX reference mirroring the PyTorch forward."""
    if graph.ndim == 2:
        out = jnp.einsum('jj,jklm->kjlm', graph, jnp.transpose(x, (1, 0, 2, 3)))
    else:
        out = jnp.einsum('kjj,kjlm->kjlm', graph, x)
    out1 = jax.nn.relu(out @ w + b)
    return x - out1[..., :out_c], out1[..., out_c:]


if __name__ == "__main__":
    key = jax.random.PRNGKey(0)

    def make_case(case_key, B, n, T, D, batched_graph):
        kx, kg, kw, kb = jax.random.split(case_key, 4)
        x = jax.random.normal(kx, (B, n, T, D), dtype=jnp.float32)
        gshape = (B, n, n) if batched_graph else (n, n)
        graph = jax.random.normal(kg, gshape, dtype=jnp.float32)
        bound = 1.0 / (D ** 0.5)              # PyTorch-style Linear init
        w = jax.random.uniform(kw, (D, 2 * D), jnp.float32, -bound, bound)
        b = jax.random.uniform(kb, (2 * D,), jnp.float32, -bound, bound)
        return x, graph, w, b

    # (B, n, T, D, batched_graph): small cases consistent with x [B,n,T,D]
    cases = [
        (2, 4, 8, 32, False),    # single tile, square [n,n] graph
        (3, 5, 7, 32, True),     # ragged M -> tail padding, batched [B,n,n] graph
        (4, 18, 8, 32, False),   # M=576 -> multi-step grid + padding
    ]

    ok = True
    for idx, (B, n, T, D, batched) in enumerate(cases):
        ck = jax.random.fold_in(key, idx)
        x, graph, w, b = make_case(ck, B, n, T, D, batched)
        his, fut = graphblock_forward(x, graph, w, b, out_c=D)
        jax.block_until_ready((his, fut))
        his_ref, fut_ref = _reference(x, graph, w, b, D)
        ok &= bool(jnp.allclose(his, his_ref, atol=1e-3, rtol=1e-3))
        ok &= bool(jnp.allclose(fut, fut_ref, atol=1e-3, rtol=1e-3))

    assert ok
    print("KERNEL_OK")
</pallas_src>

<mosaic_0001>
module attributes {stable_mosaic.version = 11 : i64} {
  func.func @_graphblock_kernel(%arg0: i32, %arg1: memref<64x32xf32, #tpu.memory_space<vmem>>, %arg2: memref<64x1xf32, #tpu.memory_space<vmem>>, %arg3: memref<32x64xf32, #tpu.memory_space<vmem>>, %arg4: memref<1x64xf32, #tpu.memory_space<vmem>>, %arg5: memref<64x64xf32, #tpu.memory_space<vmem>>) attributes {dimension_semantics = [#tpu.dimension_semantics<parallel>], iteration_bounds = array<i64: 1>, scalar_prefetch = 0 : i64, scratch_operands = 0 : i64, tpu.core_type = #tpu.core_type<tc>, window_params = [{transform_indices = @transform_0, window_bounds = array<i64: 64, 32>}, {transform_indices = @transform_1, window_bounds = array<i64: 64, 1>}, {pipeline_mode = #tpu.pipeline_mode<synchronous>, transform_indices = @transform_2, window_bounds = array<i64: 32, 64>}, {pipeline_mode = #tpu.pipeline_mode<synchronous>, transform_indices = @transform_3, window_bounds = array<i64: 1, 64>}, {transform_indices = @transform_4, window_bounds = array<i64: 64, 64>}]} {
    %c0 = arith.constant 0 : index
    %c0_0 = arith.constant 0 : index
    %0 = vector.load %arg1[%c0, %c0_0] : memref<64x32xf32, #tpu.memory_space<vmem>>, vector<64x32xf32>
    %c0_1 = arith.constant 0 : index
    %c0_2 = arith.constant 0 : index
    %1 = vector.load %arg2[%c0_1, %c0_2] : memref<64x1xf32, #tpu.memory_space<vmem>>, vector<64x1xf32>
    %2 = vector.broadcast %1 : vector<64x1xf32> to vector<64x32xf32>
    %3 = arith.mulf %0, %2 : vector<64x32xf32>
    %c0_3 = arith.constant 0 : index
    %c0_4 = arith.constant 0 : index
    %4 = vector.load %arg3[%c0_3, %c0_4] : memref<32x64xf32, #tpu.memory_space<vmem>>, vector<32x64xf32>
    %cst = arith.constant dense<0.000000e+00> : vector<64x64xf32>
    %5 = tpu.matmul %3, %4, %cst {dimension_numbers = #tpu.dot_dimension_numbers<[1], [0], [0], [1], [0, 0, 1, 1], [], []>} : vector<64x32xf32>, vector<32x64xf32>, vector<64x64xf32> -> vector<64x64xf32>
    %c0_5 = arith.constant 0 : index
    %c0_6 = arith.constant 0 : index
    %6 = vector.load %arg4[%c0_5, %c0_6] : memref<1x64xf32, #tpu.memory_space<vmem>>, vector<1x64xf32>
    %7 = vector.broadcast %6 : vector<1x64xf32> to vector<64x64xf32>
    %8 = arith.addf %5, %7 : vector<64x64xf32>
    %cst_7 = arith.constant 0.000000e+00 : f32
    %9 = vector.broadcast %cst_7 : f32 to vector<64x64xf32>
    %10 = arith.maximumf %8, %9 : vector<64x64xf32>
    %11 = vector.extract_strided_slice %10 {offsets = [0, 0], sizes = [64, 32], strides = [1, 1]} : vector<64x64xf32> to vector<64x32xf32>
    %12 = arith.subf %0, %11 : vector<64x32xf32>
    %13 = vector.extract_strided_slice %10 {offsets = [0, 32], sizes = [64, 32], strides = [1, 1]} : vector<64x64xf32> to vector<64x32xf32>
    %14 = tpu.concatenate %12, %13 in 1 : vector<64x32xf32>, vector<64x32xf32> -> vector<64x64xf32>
    %c0_8 = arith.constant 0 : index
    %c0_9 = arith.constant 0 : index
    %15 = vector.load %arg5[%c0_8, %c0_9] : memref<64x64xf32, #tpu.memory_space<vmem>>, vector<64x64xf32>
    tpu.vector_store %arg5[%c0_8, %c0_9], %14 {strides = array<i32>} : memref<64x64xf32, #tpu.memory_space<vmem>>, vector<64x64xf32>,
    return
  }
  func.func @transform_0(%arg0: i32) -> (i32, i32) {
    %c0_i32 = arith.constant 0 : i32
    %c0_i32_0 = arith.constant 0 : i32
    return %arg0, %c0_i32 : i32, i32
  }
  func.func @transform_1(%arg0: i32) -> (i32, i32) {
    %c0_i32 = arith.constant 0 : i32
    %c0_i32_0 = arith.constant 0 : i32
    return %arg0, %c0_i32 : i32, i32
  }
  func.func @transform_2(%arg0: i32) -> (i32, i32) {
    %c0_i32 = arith.constant 0 : i32
    %c0_i32_0 = arith.constant 0 : i32
    %c0_i32_1 = arith.constant 0 : i32
    return %c0_i32, %c0_i32_0 : i32, i32
  }
  func.func @transform_3(%arg0: i32) -> (i32, i32) {
    %c0_i32 = arith.constant 0 : i32
    %c0_i32_0 = arith.constant 0 : i32
    %c0_i32_1 = arith.constant 0 : i32
    return %c0_i32, %c0_i32_0 : i32, i32
  }
  func.func @transform_4(%arg0: i32) -> (i32, i32) {
    %c0_i32 = arith.constant 0 : i32
    %c0_i32_0 = arith.constant 0 : i32
    return %arg0, %c0_i32 : i32, i32
  }
}

</mosaic_0001>

<bundles_post_ra>
// kernel: graphblock_forward.1
= control target key start
LH: loop header
LB: loop body
LE: loop exit
PB: predicated region body
PF: predicated region fallthrough
CT: control target
= control target key end

     0   :  { %v315_v0 = vmov 0   ;;  %vm92_vm0 = vcmask 261120   ;;  %vm246_vm1 = vcmask 523264   ;;  %s452_s1 = inlined_call_operand.vmem [shape: f32[64,1], index: 1, kind: input, shape index: {}]   ;;  %s453_s2 = inlined_call_operand.vmem [shape: f32[32,64], index: 2, kind: input, shape index: {}]   ;;  %s454_s0 = inlined_call_operand.vmem [shape: f32[64,32], index: 0, kind: input, shape index: {}]   ;;  %s455_s3 = inlined_call_operand.vmem [shape: f32[1,64], index: 3, kind: input, shape index: {}]   ;;  %s456_s4 = inlined_call_operand.vmem [shape: f32[64,64], index: 4, kind: output, shape index: {}]  }
   0x1   :  { %314 = vset.pattern.permute.xlu1 %v315_v0  ;;  %313 = vset.pattern.permute.xlu0 %v315_v0  ;;  %v26_v1 = vld [vmem:[%s452_s1 + $0x8] sm:$0xff]  ;;  %v25_v2 = vld [vmem:[%s452_s1] sm:$0xff]  ;;  %v83_v7 = vld [vmem:[%s453_s2 + $0x10] sm:$0xff] }
   0x2   :  { %40 = vperm.xlu1 %314, %v26_v1   ;;  %35 = vperm.xlu0 %313, %v25_v2   ;;  %v30_v3 = vld [vmem:[%s452_s1 + $0x28] sm:$0xff]  ;;  %v29_v4 = vld [vmem:[%s452_s1 + $0x20] sm:$0xff]  ;;  %v84_v8 = vld [vmem:[%s453_s2 + $0x18] sm:$0xff] }
   0x3   :  { %v81_v5 = vld [vmem:[%s453_s2] sm:$0xff]  ;;  %v82_v6 = vld [vmem:[%s453_s2 + $0x8] sm:$0xff]  ;;  %v304_v10 = vpack.c.bf16 %v84_v8, %v83_v7  ;;  %v31_v11 = vld [vmem:[%s452_s1 + $0x30] sm:$0xff] }
   0x4   :  { %v300_v9 = vpack.c.bf16 %v82_v6, %v81_v5  ;;  %v27_v12 = vld [vmem:[%s452_s1 + $0x10] sm:$0xff]  ;;  %v32_v13 = vld [vmem:[%s452_s1 + $0x38] sm:$0xff]  ;;  %v18_v15 = vld [vmem:[%s454_s0 + $0x8] sm:$0xff] }
   0x5   :  { %v28_v14 = vld [vmem:[%s452_s1 + $0x18] sm:$0xff]  ;;  %v17_v16 = vld [vmem:[%s454_s0] sm:$0xff]  ;;  %v22_v21 = vld [vmem:[%s454_s0 + $0x28] sm:$0xff] }
   0x6   :  { %60 = vperm.xlu1 %314, %v30_v3   ;;  %55 = vperm.xlu0 %313, %v29_v4   ;;  %v21_v22 = vld [vmem:[%s454_s0 + $0x20] sm:$0xff]  ;;  %v23_v27 = vld [vmem:[%s454_s0 + $0x30] sm:$0xff]  ;;  %v24_v33 = vld [vmem:[%s454_s0 + $0x38] sm:$0xff] }
   0x7   :  { %301 = vmatprep.subr.bf16.mxu0 %v300_v9  ;;  %308 = vmatprep.subr.bf16.mxu1 %v300_v9  ;;  %v19_v28 = vld [vmem:[%s454_s0 + $0x10] sm:$0xff]  ;;  %v20_v34 = vld [vmem:[%s454_s0 + $0x18] sm:$0xff]  ;;  %v259_v39 = vld [vmem:[%s455_s3] ss:$0 sm:$0xff] }
   0x8   :  { %303 = vmatpush3.bf16.msra.mxu0 %v300_v9  ;;  %310 = vmatpush3.bf16.msra.mxu1 %v300_v9 }
   0x9   :  { %305 = vmatprep.subr.bf16.mxu0 %v304_v10  ;;  %309 = vmatprep.subr.bf16.mxu1 %v304_v10 }
   0xa   :  { %65 = vperm.xlu1 %314, %v31_v11   ;;  %45 = vperm.xlu0 %313, %v27_v12  }
   0xc   :  { %307 = vmatpush3.bf16.msra.mxu0 %v304_v10  ;;  %311 = vmatpush3.bf16.msra.mxu1 %v304_v10 }
   0xe   :  { %70 = vperm.xlu1 %314, %v32_v13   ;;  %50 = vperm.xlu0 %313, %v28_v14  }
  0x81   :  { %v41_v17 = vpop.permute.xlu1 %40  ;;  %v36_v18 = vpop.permute.xlu0 %35 }
  0x82   :  { %v74_v19 = vmul.f32 %v41_v17, %v18_v15  ;;  %v73_v20 = vmul.f32 %v36_v18, %v17_v16 }
  0x84   :  { %288 = vmatprep.mubr.msk.f32.mxu0 %vm92_vm0, %v73_v20 }
  0x85   :  { %v61_v23 = vpop.permute.xlu1 %60  ;;  %v56_v24 = vpop.permute.xlu0 %55  ;;  %289 = vmatmul.mubr.msk.f32.vlgmr.msra.gmra.mrb[0].mxu0 %vm92_vm0, %v74_v19 }
  0x86   :  { %v78_v25 = vmul.f32 %v61_v23, %v22_v21  ;;  %v77_v26 = vmul.f32 %v56_v24, %v21_v22 }
  0x88   :  { %294 = vmatprep.mubr.msk.f32.mxu1 %vm92_vm0, %v77_v26 }
  0x89   :  { %v66_v29 = vpop.permute.xlu1 %65  ;;  %v46_v30 = vpop.permute.xlu0 %45  ;;  %295 = vmatmul.mubr.msk.f32.vlgmr.msra.gmra.mrb[0].mxu1 %vm92_vm0, %v78_v25 }
  0x8a   :  { %v79_v31 = vmul.f32 %v66_v29, %v23_v27  ;;  %v75_v32 = vmul.f32 %v46_v30, %v19_v28 }
  0x8c   :  { %291 = vmatprep.mubr.msk.f32.mxu0 %vm92_vm0, %v75_v32  ;;  %297 = vmatprep.mubr.msk.f32.mxu1 %vm92_vm0, %v79_v31 }
  0x8d   :  { %v71_v35 = vpop.permute.xlu1 %70  ;;  %v51_v36 = vpop.permute.xlu0 %50 }
  0x8e   :  { %v80_v37 = vmul.f32 %v71_v35, %v24_v33  ;;  %v76_v38 = vmul.f32 %v51_v36, %v20_v34 }
  0x90   :  { %292 = vmatmul.mubr.msk.f32.gmra.mrb[2].mxu0 %vm92_vm0, %v76_v38  ;;  %298 = vmatmul.mubr.msk.f32.gmra.mrb[2].mxu1 %vm92_vm0, %v80_v37 }
 0x158   :  { %v290_v40 = vpop.f32.mrb[0].mxu0 }
 0x159   :  { %v189_v41 = vadd.f32 %v290_v40, %v259_v39  ;;  %v183_v42 = vpop.f32.mrb[1].mxu0 }
 0x15a   :  { %v184_v43 = vadd.f32 %v259_v39, %v183_v42 }
 0x15b   :  { %v223_v44 = vmax.f32 %v189_v41, 0.0 }
 0x15c   :  { %v222_v45 = vmax.f32 %v184_v43, 0.0  ;;  %v296_v46 = vpop.f32.mrb[0].mxu1 }
 0x15d   :  { %v231_v47 = vsub.f32 %v18_v15, %v223_v44  ;;  %v209_v48 = vadd.f32 %v296_v46, %v259_v39  ;;  %v203_v49 = vpop.f32.mrb[1].mxu1 }
 0x15e   :  { %v230_v50 = vsub.f32 %v17_v16, %v222_v45  ;;  %v204_v51 = vadd.f32 %v259_v39, %v203_v49 }
 0x15f   :  { %v239_v52 = vsel %vm92_vm0, %v231_v47, %v223_v44  ;;  %v227_v53 = vmax.f32 %v209_v48, 0.0 }
 0x160   :  { %248 = vst.msk [vmem:[%s456_s4 + $0x8] sm:$0xff] %vm246_vm1, %v239_v52  ;;  %v238_v54 = vsel %vm92_vm0, %v230_v50, %v222_v45  ;;  %v226_v55 = vmax.f32 %v204_v51, 0.0 }
 0x161   :  { %247 = vst.msk [vmem:[%s456_s4] sm:$0xff] %vm246_vm1, %v238_v54  ;;  %v235_v56 = vsub.f32 %v22_v21, %v227_v53 }
 0x162   :  { %v234_v57 = vsub.f32 %v21_v22, %v226_v55 }
 0x163   :  { %v243_v58 = vsel %vm92_vm0, %v235_v56, %v227_v53  ;;  %v293_v59 = vpop.f32.mrb[2].mxu0  ;;  %v299_v60 = vpop.f32.mrb[2].mxu1 }
 0x164   :  { %252 = vst.msk [vmem:[%s456_s4 + $0x28] sm:$0xff] %vm246_vm1, %v243_v58  ;;  %v242_v61 = vsel %vm92_vm0, %v234_v57, %v226_v55  ;;  %v199_v62 = vadd.f32 %v293_v59, %v259_v39  ;;  %v219_v63 = vadd.f32 %v299_v60, %v259_v39  ;;  %v193_v0 = vpop.f32.mrb[3].mxu0  ;;  %v213_v1 = vpop.f32.mrb[3].mxu1 }
 0x165   :  { %251 = vst.msk [vmem:[%s456_s4 + $0x20] sm:$0xff] %vm246_vm1, %v242_v61  ;;  %v194_v2 = vadd.f32 %v259_v39, %v193_v0  ;;  %v214_v3 = vadd.f32 %v259_v39, %v213_v1 }
 0x166   :  { %v225_v4 = vmax.f32 %v199_v62, 0.0  ;;  %v229_v5 = vmax.f32 %v219_v63, 0.0 }
 0x167   :  { %v224_v6 = vmax.f32 %v194_v2, 0.0  ;;  %v228_v7 = vmax.f32 %v214_v3, 0.0 }
 0x168   :  { %v233_v8 = vsub.f32 %v20_v34, %v225_v4  ;;  %v237_v9 = vsub.f32 %v24_v33, %v229_v5 }
 0x169   :  { %v232_v10 = vsub.f32 %v19_v28, %v224_v6  ;;  %v236_v11 = vsub.f32 %v23_v27, %v228_v7 }
 0x16a   :  { %v241_v12 = vsel %vm92_vm0, %v233_v8, %v225_v4  ;;  %v245_v13 = vsel %vm92_vm0, %v237_v9, %v229_v5 }
 0x16b   :  { %250 = vst.msk [vmem:[%s456_s4 + $0x18] sm:$0xff] %vm246_vm1, %v241_v12  ;;  %254 = vst.msk [vmem:[%s456_s4 + $0x38] sm:$0xff] %vm246_vm1, %v245_v13  ;;  %v240_v14 = vsel %vm92_vm0, %v232_v10, %v224_v6  ;;  %v244_v15 = vsel %vm92_vm0, %v236_v11, %v228_v7 }
 0x16c   :  { %249 = vst.msk [vmem:[%s456_s4 + $0x10] sm:$0xff] %vm246_vm1, %v240_v14  ;;  %253 = vst.msk [vmem:[%s456_s4 + $0x30] sm:$0xff] %vm246_vm1, %v244_v15 }

</bundles_post_ra>
